<compile_context>
chip_gen: v6e
topology: v6e:2x2x1
jax: 0.10.0
libtpu: 0.0.40
codegen_flags: <defaults>
</compile_context>

<pallas_src>
import functools

import jax
import jax.numpy as jnp
from jax.experimental import pallas as pl
from jax.experimental.pallas import tpu as pltpu


# ---------------------------------------------------------------------------
# Helpers
# ---------------------------------------------------------------------------
def _leaky(v, slope=0.01):
    # InPlaceABNSync default activation: leaky_relu(negative_slope=0.01).
    return jnp.maximum(v, slope * v)


def _bn_fold(gamma, beta, mean, var, eps=1e-5):
    """Fold eval-mode BN into per-channel scale/bias (f32)."""
    scale = gamma / jnp.sqrt(var + eps)
    bias = beta - mean * scale
    return scale.astype(jnp.float32), bias.astype(jnp.float32)


def _interp_taps(out_size, in_size):
    """align_corners=True bilinear: per-output-index (lo, hi, frac) taps."""
    if out_size == 1 or in_size == 1:
        src = jnp.zeros((out_size,), jnp.float32)
    else:
        src = jnp.arange(out_size, dtype=jnp.float32) * ((in_size - 1) / (out_size - 1))
    lo = jnp.clip(jnp.floor(src).astype(jnp.int32), 0, in_size - 1)
    hi = jnp.minimum(lo + 1, in_size - 1)
    frac = src - lo.astype(jnp.float32)
    return lo, hi, frac


def _interp_matrix(out_size, in_size):
    """Dense 1-D bilinear interpolation matrix (align_corners=True), f32."""
    lo, hi, frac = _interp_taps(out_size, in_size)
    rows = jnp.arange(out_size)
    M = jnp.zeros((out_size, in_size), jnp.float32)
    M = M.at[rows, lo].add(1.0 - frac)
    M = M.at[rows, hi].add(frac)
    return M


def prepare_params(params, out_hw, in_hw):
    """Fold BN into weights, cast to bf16, pad conv4 to 128 lanes, build interp tables."""
    h, w = out_hw
    ht, wt = in_hw
    bf16 = jnp.bfloat16

    s1, t1 = _bn_fold(*params["bn1"])
    s2, t2 = _bn_fold(*params["bn2"])
    s3a, t3a = _bn_fold(*params["bn3a"])
    s3b, t3b = _bn_fold(*params["bn3b"])

    Cp = params["w1"].shape[1]                 # xt channels after conv1 (256)
    w3a = params["w3a"] * s3a[None, :]         # fold BN scale into conv3a

    nc = params["w4"].shape[1]
    nc_pad = max(128, -(-nc // 128) * 128)     # lane-dense seg stores
    w4p = jnp.zeros((params["w4"].shape[0], nc_pad), jnp.float32).at[:, :nc].set(params["w4"])
    b4p = jnp.zeros((1, nc_pad), jnp.float32).at[0, :nc].set(params["b4"])

    p0h, p1h, fh = _interp_taps(h, ht)         # H-axis 2-tap interpolation tables

    return {
        "w1": (params["w1"] * s1[None, :]).astype(bf16),
        "b1": t1.reshape(1, -1),
        "w2": (params["w2"] * s2[None, :]).astype(bf16),
        "b2": t2.reshape(1, -1),
        "w3t": w3a[:Cp].astype(bf16),          # rows for the xt part of the concat
        "w3l": w3a[Cp:].astype(bf16),          # rows for the xl part of the concat
        "b3a": t3a.reshape(1, -1),
        "w3b": (params["w3b"] * s3b[None, :]).astype(bf16),
        "b3b": t3b.reshape(1, -1),
        "w4p": w4p.astype(bf16),
        "b4p": b4p,
        "w4": params["w4"].astype(bf16),       # unpadded (reference only)
        "b4": params["b4"].reshape(1, -1).astype(jnp.float32),
        "Rw": _interp_matrix(w, wt),           # (w, wt) f32, W-axis interpolation
        "p0h": p0h, "p1h": p1h, "fh": fh,      # (h,) int32 / int32 / f32
        "num_classes": nc,
    }


# ---------------------------------------------------------------------------
# Kernel 1: conv1 (1x1, 512->256) + folded BN + leaky-relu + W-axis upsample.
# ---------------------------------------------------------------------------
def conv1_wup_kernel(x_ref, w1_ref, b1_ref, rw_ref, mid_ref, *, ht_tile, wt):
    # x_ref : (1, ht_tile*wt, Cin) bf16     w1_ref: (Cin, Cp) bf16
    # b1_ref: (1, Cp) f32                   rw_ref: (w, wt)  f32
    # mid_ref: (1, ht_tile, w, Cp) bf16
    f32 = jnp.float32
    y = jnp.dot(x_ref[0], w1_ref[...], preferred_element_type=f32) + b1_ref[...]
    y = _leaky(y)                                            # (ht_tile*wt, Cp) f32
    rw = rw_ref[...]
    for i in range(ht_tile):                                 # static unroll
        row = y[i * wt:(i + 1) * wt, :]                      # (wt, Cp) f32
        up = jnp.dot(rw, row, preferred_element_type=f32)    # (w, Cp) f32
        mid_ref[0, i] = up.astype(mid_ref.dtype)


# ---------------------------------------------------------------------------
# Kernel 2: H-axis 2-tap upsample + conv2 + concat-conv3(a,b) + conv4 per row tile.
# ---------------------------------------------------------------------------
def decoder_stage2_kernel(p0_ref, p1_ref, fh_ref,                 # scalar-prefetch (SMEM)
                          mid_ref, xl_ref, w2_ref, b2_ref,
                          w3t_ref, w3l_ref, b3a_ref, w3b_ref, b3b_ref,
                          w4_ref, b4_ref,
                          seg_ref, x_ref, *, tile_h):
    f32 = jnp.float32
    bf16 = jnp.bfloat16

    r0 = pl.program_id(1) * tile_h
    # H-axis bilinear interpolation: per output row, lerp two resident mid rows (f32).
    rows = []
    for r in range(tile_h):                                   # static unroll
        rr = r0 + r
        lo = p0_ref[rr]
        hi = p1_ref[rr]
        f = fh_ref[rr]
        m_lo = mid_ref[lo].astype(f32)                        # (w, Cp)
        m_hi = mid_ref[hi].astype(f32)
        rows.append(m_lo + f * (m_hi - m_lo))
    xt_up = jnp.concatenate(rows, axis=0).astype(bf16)        # (tile_h*w, Cp)

    # conv2 (256->48) + BN + leaky-relu on the low-level feature tile.
    xl = xl_ref[0]                                            # (tile_h*w, Cl) bf16
    h2 = _leaky(jnp.dot(xl, w2_ref[...], preferred_element_type=f32)
                + b2_ref[...]).astype(bf16)

    # conv3a on cat([xt_up, xl], channel) expressed as a split matmul.
    h3 = _leaky(jnp.dot(xt_up, w3t_ref[...], preferred_element_type=f32)
                + jnp.dot(h2, w3l_ref[...], preferred_element_type=f32)
                + b3a_ref[...]).astype(bf16)

    # conv3b (256->256) + BN + leaky-relu  -> this is the returned `x` (bf16).
    xv = _leaky(jnp.dot(h3, w3b_ref[...], preferred_element_type=f32) + b3b_ref[...])
    x_ref[0] = xv.astype(x_ref.dtype)

    # conv4 (256 -> num_classes, padded to 128 lanes, with bias).
    seg_ref[0] = (jnp.dot(xv.astype(bf16), w4_ref[...], preferred_element_type=f32)
                  + b4_ref[...])


# ---------------------------------------------------------------------------
# Wrapper
# ---------------------------------------------------------------------------
def _pick_tile_h(h, w, max_elems=2048):
    """Largest row tile with tile_h | h, (tile_h*w) % 8 == 0 and <= max_elems rows*cols."""
    best = None
    for cand in range(1, h + 1):
        if h % cand == 0 and (cand * w) % 8 == 0 and cand * w <= max_elems:
            best = cand
    return best if best is not None else h


def _pick_ht_tiles(ht, wt):
    # Two stage-1 tiles keep both v7x TensorCores busy even for batch-1 calls.
    if ht % 2 == 0 and ((ht // 2) * wt) % 8 == 0:
        return 2
    return 1


def decoder_forward(xt_nhwc, xl_nhwc, prep, *, tile_h=None):
    N, ht, wt, Cin = xt_nhwc.shape
    Nl, h, w, Cl = xl_nhwc.shape
    assert N == Nl
    Cp = prep["w1"].shape[1]        # 256
    C2 = prep["w2"].shape[1]        # 48
    Cm = prep["w3b"].shape[1]       # 256
    nc_pad = prep["w4p"].shape[1]   # 128 (padded classes)
    nc = prep["num_classes"]

    xt_flat = xt_nhwc.astype(jnp.bfloat16).reshape(N, ht * wt, Cin)   # free in HBM
    xl_flat = xl_nhwc.astype(jnp.bfloat16).reshape(N, h * w, Cl)      # free in HBM

    # ---- stage 1: conv1 + BN + act + W-axis bilinear, at low-res rows ----
    nht = _pick_ht_tiles(ht, wt)
    ht_tile = ht // nht
    flops1 = N * (2 * ht * wt * Cin * Cp + ht * 2 * w * wt * Cp)
    bytes1 = (N * ht * wt * Cin * 2 + Cin * Cp * 2 + Cp * 4 + w * wt * 4
              + N * ht * w * Cp * 2)

    mid = pl.pallas_call(
        functools.partial(conv1_wup_kernel, ht_tile=ht_tile, wt=wt),
        out_shape=jax.ShapeDtypeStruct((N, ht, w, Cp), jnp.bfloat16),
        grid=(N, nht),
        in_specs=[
            pl.BlockSpec((1, ht_tile * wt, Cin), lambda n, j: (n, j, 0)),
            pl.BlockSpec((Cin, Cp), lambda n, j: (0, 0)),
            pl.BlockSpec((1, Cp), lambda n, j: (0, 0)),
            pl.BlockSpec((w, wt), lambda n, j: (0, 0)),
        ],
        out_specs=pl.BlockSpec((1, ht_tile, w, Cp), lambda n, j: (n, j, 0, 0)),
        compiler_params=pltpu.CompilerParams(
            dimension_semantics=("parallel", "parallel")),
        cost_estimate=pl.CostEstimate(flops=flops1, transcendentals=0,
                                      bytes_accessed=bytes1),
    )(xt_flat, prep["w1"], prep["b1"], prep["Rw"])

    # ---- stage 2: H-upsample + conv2 + conv3 + conv4, row-tiled, batch outermost ----
    if tile_h is None:
        tile_h = _pick_tile_h(h, w)
    assert h % tile_h == 0 and (tile_h * w) % 8 == 0
    nt = h // tile_h

    wbytes = sum(int(prep[k].size) * prep[k].dtype.itemsize
                 for k in ("w2", "w3t", "w3l", "w3b", "w4p"))
    flops2 = (N * h * w * 2 * (Cl * C2 + Cp * Cm + C2 * Cm + Cm * Cm + Cm * nc_pad)
              + N * h * w * Cp * 4)
    bytes2 = (N * h * w * Cl * 2 + N * ht * w * Cp * 2 + wbytes
              + N * h * w * nc_pad * 4 + N * h * w * Cm * 2)

    grid_spec = pltpu.PrefetchScalarGridSpec(
        num_scalar_prefetch=3,                  # p0h, p1h, fh -> SMEM
        grid=(N, nt),                           # batch outermost: mid stays resident
        in_specs=[
            pl.BlockSpec((None, ht, w, Cp), lambda n, i, *_: (n, 0, 0, 0)),  # mid (resident)
            pl.BlockSpec((1, tile_h * w, Cl), lambda n, i, *_: (n, i, 0)),   # xl tile
            pl.BlockSpec((Cl, C2), lambda n, i, *_: (0, 0)),                 # w2
            pl.BlockSpec((1, C2), lambda n, i, *_: (0, 0)),                  # b2
            pl.BlockSpec((Cp, Cm), lambda n, i, *_: (0, 0)),                 # w3 (xt part)
            pl.BlockSpec((C2, Cm), lambda n, i, *_: (0, 0)),                 # w3 (xl part)
            pl.BlockSpec((1, Cm), lambda n, i, *_: (0, 0)),                  # b3a
            pl.BlockSpec((Cm, Cm), lambda n, i, *_: (0, 0)),                 # w3b
            pl.BlockSpec((1, Cm), lambda n, i, *_: (0, 0)),                  # b3b
            pl.BlockSpec((Cm, nc_pad), lambda n, i, *_: (0, 0)),             # w4 (padded)
            pl.BlockSpec((1, nc_pad), lambda n, i, *_: (0, 0)),              # b4 (padded)
        ],
        out_specs=(pl.BlockSpec((1, tile_h * w, nc_pad), lambda n, i, *_: (n, i, 0)),
                   pl.BlockSpec((1, tile_h * w, Cm), lambda n, i, *_: (n, i, 0))),
    )

    seg_pad, x_flat = pl.pallas_call(
        functools.partial(decoder_stage2_kernel, tile_h=tile_h),
        out_shape=(jax.ShapeDtypeStruct((N, h * w, nc_pad), jnp.float32),
                   jax.ShapeDtypeStruct((N, h * w, Cm), jnp.bfloat16)),
        grid_spec=grid_spec,
        compiler_params=pltpu.CompilerParams(
            dimension_semantics=("parallel", "parallel"),
            # Re-derive per generation for production shapes (v7x: 64 MiB physical).
            vmem_limit_bytes=32 * 1024 * 1024),
        cost_estimate=pl.CostEstimate(flops=flops2, transcendentals=0,
                                      bytes_accessed=bytes2),
    )(prep["p0h"], prep["p1h"], prep["fh"], mid, xl_flat,
      prep["w2"], prep["b2"], prep["w3t"], prep["w3l"], prep["b3a"],
      prep["w3b"], prep["b3b"], prep["w4p"], prep["b4p"])

    seg = seg_pad[:, :, :nc].reshape(N, h, w, nc)
    x_out = x_flat.reshape(N, h, w, Cm)
    return seg, x_out


# ---------------------------------------------------------------------------
# Pure-JAX reference with identical cast points (for correctness checking).
# ---------------------------------------------------------------------------
def decoder_reference(xt_nhwc, xl_nhwc, prep):
    bf16 = jnp.bfloat16
    f32 = jnp.float32
    N, ht, wt, Cin = xt_nhwc.shape
    _, h, w, Cl = xl_nhwc.shape
    Cp = prep["w1"].shape[1]
    Cm = prep["w3b"].shape[1]
    nc = prep["num_classes"]

    xt = xt_nhwc.astype(bf16).reshape(N, ht * wt, Cin)
    xl = xl_nhwc.astype(bf16).reshape(N, h * w, Cl)

    y = _leaky(jnp.einsum("nkc,cd->nkd", xt, prep["w1"],
                          preferred_element_type=f32) + prep["b1"])            # f32
    y = y.reshape(N, ht, wt, Cp)
    mid = jnp.einsum("xj,nijc->nixc", prep["Rw"], y,
                     preferred_element_type=f32).astype(bf16)                  # (N,ht,w,Cp)

    m_lo = mid[:, prep["p0h"]].astype(f32)                                     # (N,h,w,Cp)
    m_hi = mid[:, prep["p1h"]].astype(f32)
    fr = prep["fh"][None, :, None, None]
    xt_up = (m_lo + fr * (m_hi - m_lo)).reshape(N, h * w, Cp).astype(bf16)

    h2 = _leaky(jnp.einsum("nsc,cd->nsd", xl, prep["w2"],
                           preferred_element_type=f32) + prep["b2"]).astype(bf16)
    h3 = _leaky(jnp.einsum("nsd,de->nse", xt_up, prep["w3t"], preferred_element_type=f32)
                + jnp.einsum("nsc,ce->nse", h2, prep["w3l"], preferred_element_type=f32)
                + prep["b3a"]).astype(bf16)
    xv = _leaky(jnp.einsum("nse,ef->nsf", h3, prep["w3b"],
                           preferred_element_type=f32) + prep["b3b"])          # f32
    seg = jnp.einsum("nsf,fk->nsk", xv.astype(bf16), prep["w4"],
                     preferred_element_type=f32) + prep["b4"]
    return seg.reshape(N, h, w, nc), xv.astype(bf16).reshape(N, h, w, Cm)


# ---------------------------------------------------------------------------
# Demo / correctness check
# ---------------------------------------------------------------------------
if __name__ == "__main__":
    # Module channel widths are fixed by the spec; spatial sizes kept small.
    N = 2
    ht, wt = 8, 8          # xt spatial (low resolution)
    h, w = 16, 16          # xl spatial (output resolution)
    num_classes = 20

    key = jax.random.PRNGKey(0)
    ks = jax.random.split(key, 16)

    def bn_params(k, c):
        k0, k1, k2, k3 = jax.random.split(k, 4)
        gamma = 1.0 + 0.1 * jax.random.normal(k0, (c,), jnp.float32)
        beta = 0.1 * jax.random.normal(k1, (c,), jnp.float32)
        mean = 0.1 * jax.random.normal(k2, (c,), jnp.float32)
        var = jax.random.uniform(k3, (c,), jnp.float32, 0.5, 1.5)
        return gamma, beta, mean, var

    params = {
        "w1": 0.05 * jax.random.normal(ks[0], (512, 256), jnp.float32),
        "bn1": bn_params(ks[1], 256),
        "w2": 0.05 * jax.random.normal(ks[2], (256, 48), jnp.float32),
        "bn2": bn_params(ks[3], 48),
        "w3a": 0.05 * jax.random.normal(ks[4], (304, 256), jnp.float32),
        "bn3a": bn_params(ks[5], 256),
        "w3b": 0.05 * jax.random.normal(ks[6], (256, 256), jnp.float32),
        "bn3b": bn_params(ks[7], 256),
        "w4": 0.05 * jax.random.normal(ks[8], (256, num_classes), jnp.float32),
        "b4": 0.05 * jax.random.normal(ks[9], (num_classes,), jnp.float32),
    }

    # PyTorch-style NCHW inputs, converted to NHWC at the boundary.
    xt_nchw = jax.random.normal(ks[10], (N, 512, ht, wt), jnp.float32)
    xl_nchw = jax.random.normal(ks[11], (N, 256, h, w), jnp.float32)
    xt_nhwc = jnp.transpose(xt_nchw, (0, 2, 3, 1))
    xl_nhwc = jnp.transpose(xl_nchw, (0, 2, 3, 1))

    prep = prepare_params(params, out_hw=(h, w), in_hw=(ht, wt))

    seg, x_out = decoder_forward(xt_nhwc, xl_nhwc, prep)
    seg = jax.block_until_ready(seg)
    x_out = jax.block_until_ready(x_out)

    seg_ref, x_ref = decoder_reference(xt_nhwc, xl_nhwc, prep)

    assert seg.shape == (N, h, w, num_classes)
    assert x_out.shape == (N, h, w, 256)
    # seg stays f32; x_out is bf16 (review), so its tolerance covers ~1 bf16 ulp.
    assert jnp.allclose(seg, seg_ref, atol=5e-3, rtol=5e-3), "seg mismatch vs reference"
    assert jnp.allclose(x_out.astype(jnp.float32), x_ref.astype(jnp.float32),
                        atol=2e-2, rtol=2e-2), "x mismatch vs reference"

    print("KERNEL_OK")
</pallas_src>

<mosaic_0001>
module attributes {stable_mosaic.version = 11 : i64} {
  func.func @conv1_wup_kernel(%arg0: i32, %arg1: i32, %arg2: memref<1x32x512xbf16, #tpu.memory_space<vmem>>, %arg3: memref<512x256xbf16, #tpu.memory_space<vmem>>, %arg4: memref<1x256xf32, #tpu.memory_space<vmem>>, %arg5: memref<16x8xf32, #tpu.memory_space<vmem>>, %arg6: memref<1x4x16x256xbf16, #tpu.memory_space<vmem>>) attributes {dimension_semantics = [#tpu.dimension_semantics<parallel>, #tpu.dimension_semantics<parallel>], iteration_bounds = array<i64: 2, 2>, scalar_prefetch = 0 : i64, scratch_operands = 0 : i64, tpu.core_type = #tpu.core_type<tc>, window_params = [{transform_indices = @transform_0, window_bounds = array<i64: 1, 32, 512>}, {pipeline_mode = #tpu.pipeline_mode<synchronous>, transform_indices = @transform_1, window_bounds = array<i64: 512, 256>}, {pipeline_mode = #tpu.pipeline_mode<synchronous>, transform_indices = @transform_2, window_bounds = array<i64: 1, 256>}, {pipeline_mode = #tpu.pipeline_mode<synchronous>, transform_indices = @transform_3, window_bounds = array<i64: 16, 8>}, {transform_indices = @transform_4, window_bounds = array<i64: 1, 4, 16, 256>}]} {
    %c0 = arith.constant 0 : index
    %c0_0 = arith.constant 0 : index
    %c0_1 = arith.constant 0 : index
    %0 = vector.load %arg2[%c0, %c0_0, %c0_1] : memref<1x32x512xbf16, #tpu.memory_space<vmem>>, vector<1x32x512xbf16>
    %1 = vector.shape_cast %0 : vector<1x32x512xbf16> to vector<32x512xbf16>
    %c0_2 = arith.constant 0 : index
    %c0_3 = arith.constant 0 : index
    %2 = vector.load %arg3[%c0_2, %c0_3] : memref<512x256xbf16, #tpu.memory_space<vmem>>, vector<512x256xbf16>
    %cst = arith.constant dense<0.000000e+00> : vector<32x256xf32>
    %3 = tpu.matmul %1, %2, %cst {dimension_numbers = #tpu.dot_dimension_numbers<[1], [0], [0], [1], [0, 0, 1, 1], [], []>} : vector<32x512xbf16>, vector<512x256xbf16>, vector<32x256xf32> -> vector<32x256xf32>
    %c0_4 = arith.constant 0 : index
    %c0_5 = arith.constant 0 : index
    %4 = vector.load %arg4[%c0_4, %c0_5] : memref<1x256xf32, #tpu.memory_space<vmem>>, vector<1x256xf32>
    %5 = vector.broadcast %4 : vector<1x256xf32> to vector<32x256xf32>
    %6 = arith.addf %3, %5 : vector<32x256xf32>
    %cst_6 = arith.constant 0.00999999977 : f32
    %7 = vector.broadcast %cst_6 : f32 to vector<32x256xf32>
    %8 = arith.mulf %7, %6 : vector<32x256xf32>
    %9 = arith.maximumf %6, %8 : vector<32x256xf32>
    %c0_7 = arith.constant 0 : index
    %c0_8 = arith.constant 0 : index
    %10 = vector.load %arg5[%c0_7, %c0_8] : memref<16x8xf32, #tpu.memory_space<vmem>>, vector<16x8xf32>
    %11 = vector.extract_strided_slice %9 {offsets = [0, 0], sizes = [8, 256], strides = [1, 1]} : vector<32x256xf32> to vector<8x256xf32>
    %cst_9 = arith.constant dense<0.000000e+00> : vector<16x256xf32>
    %12 = tpu.matmul %10, %11, %cst_9 {dimension_numbers = #tpu.dot_dimension_numbers<[1], [0], [0], [1], [0, 0, 1, 1], [], []>} : vector<16x8xf32>, vector<8x256xf32>, vector<16x256xf32> -> vector<16x256xf32>
    %13 = arith.truncf %12 : vector<16x256xf32> to vector<16x256xbf16>
    %c0_10 = arith.constant 0 : index
    %c0_11 = arith.constant 0 : index
    %c0_12 = arith.constant 0 : index
    %c0_13 = arith.constant 0 : index
    %14 = vector.load %arg6[%c0_10, %c0_11, %c0_12, %c0_13] : memref<1x4x16x256xbf16, #tpu.memory_space<vmem>>, vector<1x1x16x256xbf16>
    %15 = vector.shape_cast %14 : vector<1x1x16x256xbf16> to vector<16x256xbf16>
    %16 = vector.shape_cast %13 : vector<16x256xbf16> to vector<1x1x16x256xbf16>
    tpu.vector_store %arg6[%c0_10, %c0_11, %c0_12, %c0_13], %16 {strides = array<i32>} : memref<1x4x16x256xbf16, #tpu.memory_space<vmem>>, vector<1x1x16x256xbf16>,
    %17 = vector.extract_strided_slice %9 {offsets = [8, 0], sizes = [8, 256], strides = [1, 1]} : vector<32x256xf32> to vector<8x256xf32>
    %cst_14 = arith.constant dense<0.000000e+00> : vector<16x256xf32>
    %18 = tpu.matmul %10, %17, %cst_14 {dimension_numbers = #tpu.dot_dimension_numbers<[1], [0], [0], [1], [0, 0, 1, 1], [], []>} : vector<16x8xf32>, vector<8x256xf32>, vector<16x256xf32> -> vector<16x256xf32>
    %19 = arith.truncf %18 : vector<16x256xf32> to vector<16x256xbf16>
    %c0_15 = arith.constant 0 : index
    %c1 = arith.constant 1 : index
    %c0_16 = arith.constant 0 : index
    %c0_17 = arith.constant 0 : index
    %20 = vector.load %arg6[%c0_15, %c1, %c0_16, %c0_17] : memref<1x4x16x256xbf16, #tpu.memory_space<vmem>>, vector<1x1x16x256xbf16>
    %21 = vector.shape_cast %20 : vector<1x1x16x256xbf16> to vector<16x256xbf16>
    %22 = vector.shape_cast %19 : vector<16x256xbf16> to vector<1x1x16x256xbf16>
    tpu.vector_store %arg6[%c0_15, %c1, %c0_16, %c0_17], %22 {strides = array<i32>} : memref<1x4x16x256xbf16, #tpu.memory_space<vmem>>, vector<1x1x16x256xbf16>,
    %23 = vector.extract_strided_slice %9 {offsets = [16, 0], sizes = [8, 256], strides = [1, 1]} : vector<32x256xf32> to vector<8x256xf32>
    %cst_18 = arith.constant dense<0.000000e+00> : vector<16x256xf32>
    %24 = tpu.matmul %10, %23, %cst_18 {dimension_numbers = #tpu.dot_dimension_numbers<[1], [0], [0], [1], [0, 0, 1, 1], [], []>} : vector<16x8xf32>, vector<8x256xf32>, vector<16x256xf32> -> vector<16x256xf32>
    %25 = arith.truncf %24 : vector<16x256xf32> to vector<16x256xbf16>
    %c0_19 = arith.constant 0 : index
    %c2 = arith.constant 2 : index
    %c0_20 = arith.constant 0 : index
    %c0_21 = arith.constant 0 : index
    %26 = vector.load %arg6[%c0_19, %c2, %c0_20, %c0_21] : memref<1x4x16x256xbf16, #tpu.memory_space<vmem>>, vector<1x1x16x256xbf16>
    %27 = vector.shape_cast %26 : vector<1x1x16x256xbf16> to vector<16x256xbf16>
    %28 = vector.shape_cast %25 : vector<16x256xbf16> to vector<1x1x16x256xbf16>
    tpu.vector_store %arg6[%c0_19, %c2, %c0_20, %c0_21], %28 {strides = array<i32>} : memref<1x4x16x256xbf16, #tpu.memory_space<vmem>>, vector<1x1x16x256xbf16>,
    %29 = vector.extract_strided_slice %9 {offsets = [24, 0], sizes = [8, 256], strides = [1, 1]} : vector<32x256xf32> to vector<8x256xf32>
    %cst_22 = arith.constant dense<0.000000e+00> : vector<16x256xf32>
    %30 = tpu.matmul %10, %29, %cst_22 {dimension_numbers = #tpu.dot_dimension_numbers<[1], [0], [0], [1], [0, 0, 1, 1], [], []>} : vector<16x8xf32>, vector<8x256xf32>, vector<16x256xf32> -> vector<16x256xf32>
    %31 = arith.truncf %30 : vector<16x256xf32> to vector<16x256xbf16>
    %c0_23 = arith.constant 0 : index
    %c3 = arith.constant 3 : index
    %c0_24 = arith.constant 0 : index
    %c0_25 = arith.constant 0 : index
    %32 = vector.load %arg6[%c0_23, %c3, %c0_24, %c0_25] : memref<1x4x16x256xbf16, #tpu.memory_space<vmem>>, vector<1x1x16x256xbf16>
    %33 = vector.shape_cast %32 : vector<1x1x16x256xbf16> to vector<16x256xbf16>
    %34 = vector.shape_cast %31 : vector<16x256xbf16> to vector<1x1x16x256xbf16>
    tpu.vector_store %arg6[%c0_23, %c3, %c0_24, %c0_25], %34 {strides = array<i32>} : memref<1x4x16x256xbf16, #tpu.memory_space<vmem>>, vector<1x1x16x256xbf16>,
    return
  }
  func.func @transform_0(%arg0: i32, %arg1: i32) -> (i32, i32, i32) {
    %c0_i32 = arith.constant 0 : i32
    %c0_i32_0 = arith.constant 0 : i32
    return %arg0, %arg1, %c0_i32 : i32, i32, i32
  }
  func.func @transform_1(%arg0: i32, %arg1: i32) -> (i32, i32) {
    %c0_i32 = arith.constant 0 : i32
    %c0_i32_0 = arith.constant 0 : i32
    %c0_i32_1 = arith.constant 0 : i32
    return %c0_i32, %c0_i32_0 : i32, i32
  }
  func.func @transform_2(%arg0: i32, %arg1: i32) -> (i32, i32) {
    %c0_i32 = arith.constant 0 : i32
    %c0_i32_0 = arith.constant 0 : i32
    %c0_i32_1 = arith.constant 0 : i32
    return %c0_i32, %c0_i32_0 : i32, i32
  }
  func.func @transform_3(%arg0: i32, %arg1: i32) -> (i32, i32) {
    %c0_i32 = arith.constant 0 : i32
    %c0_i32_0 = arith.constant 0 : i32
    %c0_i32_1 = arith.constant 0 : i32
    return %c0_i32, %c0_i32_0 : i32, i32
  }
  func.func @transform_4(%arg0: i32, %arg1: i32) -> (i32, i32, i32, i32) {
    %c0_i32 = arith.constant 0 : i32
    %c0_i32_0 = arith.constant 0 : i32
    %c0_i32_1 = arith.constant 0 : i32
    return %arg0, %arg1, %c0_i32, %c0_i32_0 : i32, i32, i32, i32
  }
}

</mosaic_0001>

<bundles_post_ra>
// kernel: tpu_custom_call.1
= control target key start
LH: loop header
LB: loop body
LE: loop exit
PB: predicated region body
PF: predicated region fallthrough
CT: control target
= control target key end

     0   :  { %s2078_s0 = inlined_call_operand.hbm [shape: bf16[2,64,512], index: 0, kind: input, shape index: {}]   ;;  %s2079_s1 = inlined_call_operand.hbm [shape: bf16[512,256], index: 1, kind: input, shape index: {}]   ;;  %s2080_s2 = inlined_call_operand.vmem [shape: f32[1,256], index: 2, kind: input, shape index: {}]   ;;  %s2081_s3 = inlined_call_operand.vmem [shape: f32[16,8], index: 3, kind: input, shape index: {}]   ;;  %s2082_s4 = inlined_call_operand.hbm [shape: bf16[2,8,16,256], index: 4, kind: output, shape index: {}]  }
   0x1   :  { %2089 = sst [smem:[#allocation15_spill]] %s2079_s1 }
   0x2   :  { %2090 = sst [smem:[#allocation16_spill]] %s2082_s4 }
   0x3   :  { %9 = vsyncpa [#allocation3], 0 }
   0x4   :  { %11 = vsyncpa [#allocation3 + $0x1], 0 }
   0x5   :  { %12 = vsyncpa [#allocation6], 0 }
   0x6   :  { %13 = vsyncpa [#allocation4], 0 }
   0x7   :  { %15 = vsyncpa [#allocation4 + $0x1], 0  ;;  %s1831_s15 = smov 0   ;;  %s1833_s16 = smov 0  }
   0x8   :  { %s1835_s17 = smov 0   ;;  %s1837_s18 = smov 0  }
   0x9   :  { %s1839_s19 = smov 0   ;;  %s1841_s20 = smov 0  }
   0xa   :  { %s1843_s21 = smov 0   ;;  %s1845_s22 = smov 0  }
   0xb LB: > { %2091 = sst [smem:[#allocation11_spill]] %s1766_s15  ;;  %s1311_s23 = sadd.s32 4294967295, %s1794_s22   ;;  %s1794_s22 = sphi %s1845_s22, %s21_s22   ;;  %s1790_s21 = sphi %s1843_s21, %s2115_s21   ;;  %s1786_s20 = sphi %s1841_s20, %s2110_s20   ;;  %s1782_s19 = sphi %s1839_s19, %s2114_s19   ;;  %s1778_s18 = sphi %s1837_s18, %s2109_s18   ;;  %s1774_s17 = sphi %s1835_s17, %s2113_s17   ;;  %s1770_s16 = sphi %s1833_s16, %s2112_s16   ;;  %s1766_s15 = sphi %s1831_s15, %s2111_s15  }
   0xc   : > { %2092 = sst [smem:[#allocation12_spill]] %s1786_s20  ;;  %s1312_s24 = sadd.s32 4294967294, %s1794_s22  }
   0xd   : > { %p55_p0 = scmp.ne.s32.totalorder %s1770_s16, %s1766_s15  ;;  %p1875_p1 = scmp.eq.s32.totalorder %s1311_s23, 0 }
   0xe   : > { %p1879_p2 = scmp.eq.s32.totalorder %s1311_s23, 3  ;;  %p150_p3 = scmp.eq.s32.totalorder %s1312_s24, 3 }
   0xf   : > { %p1885_p4 = por %p1875_p1, %p55_p0  ;;  %p1313_p5 = scmp.ge.s32.totalorder %s1794_s22, 1 }
  0x10   : > { %p1890_p6 = por %p150_p3, %p55_p0  ;;  %p157_p7 = scmp.lt.s32.totalorder %s1794_s22, 5 }
  0x11   : > { %s2095_s27 = scalar_select %p1885_p4, 1, 0 }
  0x12   : > { %s2096_s28 = scalar_select %p1890_p6, 1, 0 }
  0x13   : > { %p1895_p8 = pnand %p1313_p5, %p157_p7  ;;  %s1796_s30 = smov [#allocation5]  }
  0x14   : > { %2097 = sst [smem:[#allocation13_spill]] %s2096_s28  ;;  %s169_s5 = sshll.u32 %s1796_s30, 4  ;;  %s170_s5 = int_to_ptr.vmem [resolvable:$true] %s169_s5 }
  0x15   : > { %p1444_p9 = pneg %p1895_p8  ;;  %s1651_s6 = scalar_lea.vmem %s170_s5, 8192 }
  0x16   : > { %p1652_p12 = scmp.ne.s32.totalorder %s170_s5, %s1651_s6  ;;  %p1659_p3 = scmp.lt.s32.totalorder %s170_s5, %s170_s5 }
  0x17   : > { %p1445_p10 = pnand %p1444_p9, %p1875_p1  ;;  %p1660_p6 = scmp.lt.s32.totalorder %s1651_s6, %s1651_s6 }
  0x19   : > { %p1642_p11 = pneg %p1445_p10  ;;  %p1661_p4 = por %p1660_p6, %p1659_p3 }
  0x1b   : > { %p1654_p13 = pnand %p1652_p12, %p1642_p11 }
  0x1d   : > { %p1655_p0 = pneg %p1654_p13 }
  0x1f   : > { %p1662_p5 = pnand %p1661_p4, %p1655_p0 }
  0x21   : > { %1665 = shalt.err (!%p1662_p5)
}
  0x22   : > { %s1797_s7 = smov 128   ;;  %s1798_s8 = smov 8  }
  0x23   : > { %s2099_s1 = sld [smem:[#allocation15_spill]]  ;;  %s30_s11 = sadd.s32 1, %s1786_s20 }
  0x24   : > { %p31_p4 = scmp.ge.s32.totalorder %s30_s11, 2  ;;  %s33_s12 = sadd.s32 1, %s1790_s21 }
  0x25   : > { %s42_s13 = sadd.s32 1, %s1774_s17  ;;  %p49_p6 = scmp.ne.s32.totalorder %s1774_s17, %s1770_s16 }
  0x26   : > { %s2117_s11 = smov (%p31_p4, %s30_s11), 0  ;;  %s2119_s12 = smov (!%p31_p4, %s33_s12), %s1790_s21 }
  0x27   : > { %2100 = sst [smem:[#allocation14_spill]] %s2117_s11  ;;  %s38_s14 = ssub.s32 %s1786_s20, %s2117_s11 }
  0x28   : > { %p50_p7 = scmp.eq.s32.totalorder %s1794_s22, 0  ;;  %p35_p9 = scmp.ge.s32.totalorder %s2119_s12, 2 }
  0x29   : > { %1447 = dma.hbm_to_vmem [thread:$0]  (!%p1445_p10), %s2099_s1, 8192, %s170_s5, [#allocation6], %s1797_s7, %s1797_s7, %s1798_s8  }
  0x2a   : > { %p1919_p11 = por %p1879_p2, %p49_p6  ;;  %p1923_p10 = por %p50_p7, %p49_p6 }
  0x2b   : > { %p1457_p12 = scmp.lt.s32.totalorder %s1794_s22, 4  ;;  %s2121_s12 = smov (%p35_p9, %s2119_s12), 0 }
  0x2c   : > { %s189_s30 = sand.u32 1, %s1774_s17   ;;  %s1426_s5 = sshll.u32 %s1786_s20, 4 }
  0x2d   : > { %s37_s6 = ssub.s32 %s1790_s21, %s2121_s12  ;;  %s1316_s8 = sshll.u32 %s189_s30, 6 }
  0x2e   : > { %s39_s7 = sor.u32 %s38_s14, %s37_s6  ;;  %s1319_s26 = sshll.u32 %s1790_s21, 5 }
  0x2f   : > { %p40_p13 = scmp.eq.s32.totalorder %s39_s7, 0  ;;  %s193_s9 = scalar_lea.vmem [#allocation2], %s1316_s8 }
  0x30   : > { %s203_s10 = sshll.u32 %s193_s9, 4  ;;  %s200_s11 = sadd.s32 %s1426_s5, %s1319_s26  ;;  %s204_s10 = int_to_ptr.vmem [resolvable:$true] %s203_s10 }
  0x31   : > { %s1936_s1 = scalar_select %p40_p13, %s1774_s17, %s42_s13  }
  0x32   : > { %s1320_s28 = sshll.u32 %s200_s11, 6  ;;  %p1942_p2 = pnand %p1457_p12, %p1923_p10 }
  0x33   : > { %s202_s14 = scalar_lea.hbm %s2078_s0, %s1320_s28  ;;  %s190_s6 = scalar_lea.sflag [#allocation3], %s189_s30 }
  0x34   : > { %p1668_p0 = pneg %p1942_p2  ;;  %s1679_s7 = scalar_lea.vmem %s204_s10, 1024 }
  0x35   : > { %p1680_p3 = scmp.ne.s32.totalorder %s204_s10, %s1679_s7  ;;  %s1799_s13 = smov [#allocation2]  }
  0x36   : > { %s1684_s11 = sshll.u32 %s1799_s13, 4  ;;  %s1685_s11 = int_to_ptr.vmem [resolvable:$false] %s1684_s11 }
  0x37   : > { %p1682_p5 = pnand %p1680_p3, %p1668_p0  ;;  %s1686_s24 = scalar_lea.vmem %s1685_s11, 2048 }
  0x38   : > { %p1687_p6 = scmp.lt.s32.totalorder %s204_s10, %s1685_s11  ;;  %p1688_p7 = scmp.lt.s32.totalorder %s1686_s24, %s1679_s7 }
  0x39   : > { %p1683_p4 = pneg %p1682_p5 }
  0x3a   : > { %p1689_p9 = por %p1688_p7, %p1687_p6 }
  0x3c   : > { %p1690_p10 = pnand %p1689_p9, %p1683_p4 }
  0x3e   : > { %1693 = shalt.err (!%p1690_p10)
}
  0x3f   : > { %s1800_s5 = smov 256   ;;  %s1801_s4 = smov 16  }
  0x40   : > { %1451 = dma.hbm_to_vmem [thread:$0]  (!%p1942_p2), %s202_s14, 1024, %s204_s10, %s190_s6, %s1800_s5, %s1800_s5, %s1801_s4  }
  0x41   : > { %215 = sbr.rel (%p1895_p8) target bundleno = 570 (0x23a), region = 36  ;;  %s1956_s20 = sand.u32 (!%p1895_p8), 1, %s1770_s16  }
  0x42   : > { %s1322_s28 = sshll.u32 (!%p1895_p8), %s1956_s20, 6  ;;  %s218_s30 = scalar_lea.sflag (!%p1895_p8), [#allocation3], %s1956_s20 }
  0x43   : > { %s1962_s8 = scalar_lea.vmem (!%p1895_p8), [#allocation2], %s1322_s28  ;;  %p2104_p12 = scmp.ne.s32.totalorder (!%p1895_p8), %s2095_s27, 0 }
  0x46   : > { %1753 = dma.done.wait (%p2104_p12), %s218_s30, 1024  }
  0x47   : > { %1755 = vsyncadd (%p2104_p12), %s218_s30, 4294966272 }
  0x48   : > { %1757 = dma.done.wait (%p1875_p1), [#allocation6], 8192  }
  0x49   : > { %1759 = vsyncadd (%p1875_p1), [#allocation6], 4294959104  ;;  %v1532_v0 = vld [vmem:[#allocation5 + $0x74] ss:$8 sps:$4 sm:$0xff]   ;;  %v1536_v2 = vld [vmem:[#allocation5 + $0x70] ss:$8 sps:$4 sm:$0xff]  }
  0x4a   : > { %v1534_v1 = vld [vmem:[#allocation5 + $0x174] ss:$8 sps:$4 sm:$0xff]   ;;  %696 = vmatprep.subr.bf16.mxu0 %v1532_v0  ;;  %v1537_v3 = vld [vmem:[#allocation5 + $0x170] ss:$8 sps:$4 sm:$0xff]   ;;  %v1538_v4 = vld [vmem:[#allocation5 + $0x64] ss:$8 sps:$4 sm:$0xff]  }
  0x4b   : > { %749 = vmatprep.subr.bf16.mxu1 %v1534_v1  ;;  %697 = vmatpush1.bf16.msra.mxu0 %v1536_v2  ;;  %v1540_v5 = vld [vmem:[#allocation5 + $0x164] ss:$8 sps:$4 sm:$0xff]   ;;  %v1542_v6 = vld [vmem:[#allocation5 + $0x60] ss:$8 sps:$4 sm:$0xff]   ;;  %v1544_v8 = vld [vmem:[#allocation5 + $0x54] ss:$8 sps:$4 sm:$0xff]  }
  0x4c   : > { %750 = vmatpush1.bf16.msra.mxu1 %v1537_v3  ;;  %698 = vmatprep.subr.bf16.mxu0 %v1538_v4  ;;  %v1543_v7 = vld [vmem:[#allocation5 + $0x160] ss:$8 sps:$4 sm:$0xff]   ;;  %v1546_v9 = vld [vmem:[#allocation5 + $0x154] ss:$8 sps:$4 sm:$0xff]   ;;  %v1548_v10 = vld [vmem:[#allocation5 + $0x50] ss:$8 sps:$4 sm:$0xff]  }
  0x4d   : > { %751 = vmatprep.subr.bf16.mxu1 %v1540_v5  ;;  %v1549_v11 = vld [vmem:[#allocation5 + $0x150] ss:$8 sps:$4 sm:$0xff]   ;;  %v1550_v12 = vld [vmem:[#allocation5 + $0x44] ss:$8 sps:$4 sm:$0xff]   ;;  %v1554_v14 = vld [vmem:[#allocation5 + $0x40] ss:$8 sps:$4 sm:$0xff]  }
  0x4e   : > { %v1552_v13 = vld [vmem:[#allocation5 + $0x144] ss:$8 sps:$4 sm:$0xff]   ;;  %v1555_v15 = vld [vmem:[#allocation5 + $0x140] ss:$8 sps:$4 sm:$0xff]   ;;  %v1556_v16 = vld [vmem:[#allocation5 + $0x34] ss:$8 sps:$4 sm:$0xff]  }
  0x4f   : > { %699 = vmatpush1.bf16.msra.mxu0 %v1542_v6  ;;  %v1558_v17 = vld [vmem:[#allocation5 + $0x134] ss:$8 sps:$4 sm:$0xff]   ;;  %v1560_v18 = vld [vmem:[#allocation5 + $0x30] ss:$8 sps:$4 sm:$0xff]   ;;  %v1562_v20 = vld [vmem:[#allocation5 + $0x24] ss:$8 sps:$4 sm:$0xff]  }
  0x50   : > { %752 = vmatpush1.bf16.msra.mxu1 %v1543_v7  ;;  %700 = vmatprep.subr.bf16.mxu0 %v1544_v8  ;;  %v1561_v19 = vld [vmem:[#allocation5 + $0x130] ss:$8 sps:$4 sm:$0xff]   ;;  %v1564_v21 = vld [vmem:[#allocation5 + $0x124] ss:$8 sps:$4 sm:$0xff]   ;;  %v1566_v22 = vld [vmem:[#allocation5 + $0x20] ss:$8 sps:$4 sm:$0xff]  }
  0x51   : > { %753 = vmatprep.subr.bf16.mxu1 %v1546_v9  ;;  %v1567_v23 = vld [vmem:[#allocation5 + $0x120] ss:$8 sps:$4 sm:$0xff]   ;;  %v1568_v24 = vld [vmem:[#allocation5 + $0x14] ss:$8 sps:$4 sm:$0xff]   ;;  %v1572_v26 = vld [vmem:[#allocation5 + $0x10] ss:$8 sps:$4 sm:$0xff]   ;;  %v326_v9 = vlaneseq }
  0x52   : > { %v1570_v25 = vld [vmem:[#allocation5 + $0x114] ss:$8 sps:$4 sm:$0xff]   ;;  %v1573_v27 = vld [vmem:[#allocation5 + $0x110] ss:$8 sps:$4 sm:$0xff]   ;;  %v1574_v28 = vld [vmem:[#allocation5 + $0x4] ss:$8 sps:$4 sm:$0xff]  }
  0x53   : > { %701 = vmatpush1.bf16.msra.mxu0 %v1548_v10  ;;  %v1576_v29 = vld [vmem:[#allocation5 + $0x104] ss:$8 sps:$4 sm:$0xff]   ;;  %v1578_v30 = vld [vmem:[#allocation5] ss:$8 sps:$4 sm:$0xff]   ;;  %v1580_v32 = vld [vmem:[#allocation5 + $0xf4] ss:$8 sps:$4 sm:$0xff]  }
  0x54   : > { %754 = vmatpush1.bf16.msra.mxu1 %v1549_v11  ;;  %702 = vmatprep.subr.bf16.mxu0 %v1550_v12  ;;  %v1579_v31 = vld [vmem:[#allocation5 + $0x100] ss:$8 sps:$4 sm:$0xff]   ;;  %v1582_v33 = vld [vmem:[#allocation5 + $0x1f4] ss:$8 sps:$4 sm:$0xff]   ;;  %v1584_v34 = vld [vmem:[#allocation5 + $0xf0] ss:$8 sps:$4 sm:$0xff]  }
  0x55   : > { %755 = vmatprep.subr.bf16.mxu1 %v1552_v13  ;;  %v1585_v35 = vld [vmem:[#allocation5 + $0x1f0] ss:$8 sps:$4 sm:$0xff]   ;;  %v1586_v36 = vld [vmem:[#allocation5 + $0xe4] ss:$8 sps:$4 sm:$0xff]   ;;  %v1590_v38 = vld [vmem:[#allocation5 + $0xe0] ss:$8 sps:$4 sm:$0xff]  }
  0x56   : > { %v1588_v37 = vld [vmem:[#allocation5 + $0x1e4] ss:$8 sps:$4 sm:$0xff]   ;;  %v1591_v39 = vld [vmem:[#allocation5 + $0x1e0] ss:$8 sps:$4 sm:$0xff]   ;;  %v1592_v40 = vld [vmem:[#allocation5 + $0xd4] ss:$8 sps:$4 sm:$0xff]  }
  0x57   : > { %703 = vmatpush1.bf16.msra.mxu0 %v1554_v14  ;;  %v1594_v41 = vld [vmem:[#allocation5 + $0x1d4] ss:$8 sps:$4 sm:$0xff]   ;;  %v1596_v42 = vld [vmem:[#allocation5 + $0xd0] ss:$8 sps:$4 sm:$0xff]   ;;  %v1598_v44 = vld [vmem:[#allocation5 + $0xc4] ss:$8 sps:$4 sm:$0xff]  }
  0x58   : > { %756 = vmatpush1.bf16.msra.mxu1 %v1555_v15  ;;  %704 = vmatprep.subr.bf16.mxu0 %v1556_v16  ;;  %v1597_v43 = vld [vmem:[#allocation5 + $0x1d0] ss:$8 sps:$4 sm:$0xff]   ;;  %v1600_v45 = vld [vmem:[#allocation5 + $0x1c4] ss:$8 sps:$4 sm:$0xff]   ;;  %v1602_v46 = vld [vmem:[#allocation5 + $0xc0] ss:$8 sps:$4 sm:$0xff]  }
  0x59   : > { %757 = vmatprep.subr.bf16.mxu1 %v1558_v17  ;;  %v1603_v47 = vld [vmem:[#allocation5 + $0x1c0] ss:$8 sps:$4 sm:$0xff]   ;;  %v1604_v48 = vld [vmem:[#allocation5 + $0xb4] ss:$8 sps:$4 sm:$0xff]   ;;  %v1608_v52 = vld [vmem:[#allocation5 + $0xb0] ss:$8 sps:$4 sm:$0xff]  }
  0x5a   : > { %v1630_v49 = vld [vmem:[%s1962_s8 + $0x4] ss:$16 sps:$4 sm:$0xff]   ;;  %v1633_v51 = vld [vmem:[%s1962_s8 + $0xc] ss:$16 sps:$4 sm:$0xff]   ;;  %v1609_v53 = vld [vmem:[#allocation5 + $0x1b0] ss:$8 sps:$4 sm:$0xff]  }
  0x5b   : > { %705 = vmatpush1.bf16.msra.mxu0 %v1560_v18  ;;  %v1606_v50 = vld [vmem:[#allocation5 + $0x1b4] ss:$8 sps:$4 sm:$0xff]   ;;  %728 = vmatprep.mubr.bf16.mxu0 %v1630_v49  ;;  %v1610_v54 = vld [vmem:[#allocation5 + $0xa4] ss:$8 sps:$4 sm:$0xff]   ;;  %v1614_v56 = vld [vmem:[#allocation5 + $0xa0] ss:$8 sps:$4 sm:$0xff]  }
  0x5c   : > { %758 = vmatpush1.bf16.msra.mxu1 %v1561_v19  ;;  %706 = vmatprep.subr.bf16.mxu0 %v1562_v20  ;;  %v1612_v55 = vld [vmem:[#allocation5 + $0x1a4] ss:$8 sps:$4 sm:$0xff]   ;;  %v1615_v57 = vld [vmem:[#allocation5 + $0x1a0] ss:$8 sps:$4 sm:$0xff]   ;;  %v1616_v58 = vld [vmem:[#allocation5 + $0x94] ss:$8 sps:$4 sm:$0xff]  }
  0x5d   : > { %759 = vmatprep.subr.bf16.mxu1 %v1564_v21  ;;  %781 = vmatprep.mubr.bf16.mxu1 %v1633_v51  ;;  %v1618_v59 = vld [vmem:[#allocation5 + $0x194] ss:$8 sps:$4 sm:$0xff]   ;;  %v1620_v60 = vld [vmem:[#allocation5 + $0x90] ss:$8 sps:$4 sm:$0xff]   ;;  %v1622_v62 = vld [vmem:[#allocation5 + $0x84] ss:$8 sps:$4 sm:$0xff]  }
  0x5e   : > { %v1621_v61 = vld [vmem:[#allocation5 + $0x190] ss:$8 sps:$4 sm:$0xff]   ;;  %v1624_v63 = vld [vmem:[#allocation5 + $0x184] ss:$8 sps:$4 sm:$0xff]   ;;  %v1626_v0 = vld [vmem:[#allocation5 + $0x80] ss:$8 sps:$4 sm:$0xff]  }
  0x5f   : > { %707 = vmatpush1.bf16.msra.mxu0 %v1566_v22  ;;  %v1627_v1 = vld [vmem:[#allocation5 + $0x180] ss:$8 sps:$4 sm:$0xff]   ;;  %v1634_v4 = vld [vmem:[%s1962_s8 + $0x24] ss:$16 sps:$4 sm:$0xff]   ;;  %v1637_v5 = vld [vmem:[%s1962_s8 + $0x2c] ss:$16 sps:$4 sm:$0xff]  }
  0x60   : > { %760 = vmatpush1.bf16.msra.mxu1 %v1567_v23  ;;  %708 = vmatprep.subr.bf16.mxu0 %v1568_v24  ;;  %v1628_v2 = vld [vmem:[%s1962_s8] ss:$16 sps:$4 sm:$0xff]   ;;  %v1631_v3 = vld [vmem:[%s1962_s8 + $0x8] ss:$16 sps:$4 sm:$0xff]   ;;  %v1802_v8 = vmov 0.0   ;;  %v327_v10 = vshrl.u32 %v326_v9, 7 }
  0x61   : > { %761 = vmatprep.subr.bf16.mxu1 %v1570_v25  ;;  %v1636_v6 = vld [vmem:[%s1962_s8 + $0x20] ss:$16 sps:$4 sm:$0xff]   ;;  %v1639_v7 = vld [vmem:[%s1962_s8 + $0x28] ss:$16 sps:$4 sm:$0xff]   ;;  %vm820_vm0 = vcmask 64512   ;;  %s2007_s10 = scalar_lea.vmem [#allocation7], %s1322_s28 }
  0x62   : > { %v328_v11 = vsub.s32 0, %v327_v10  ;;  %v324_v12 = vld [vmem:[%s2080_s2] sm:$0x3]  ;;  %v332_v13 = vsub.s32 1, %v327_v10  ;;  %s1435_s14 = sshll.u32 %s1778_s18, 4  ;;  %s1422_s6 = sshll.u32 %s1782_s19, 5 }
  0x63   : > { %709 = vmatpush1.bf16.msra.mxu0 %v1572_v26  ;;  %s1208_s7 = sadd.s32 %s1435_s14, %s1422_s6  ;;  %s1211_s13 = sshll.u32 %s2007_s10, 4  ;;  %s2017_s13 = int_to_ptr.vmem [resolvable:$true] %s1211_s13 }
  0x64   : > { %762 = vmatpush1.bf16.msra.mxu1 %v1573_v27  ;;  %710 = vmatprep.subr.bf16.mxu0 %v1574_v28  ;;  %v329_v14 = vrot.slane %v324_v12, %v328_v11  ;;  %v333_v15 = vrot.slane %v324_v12, %v332_v13  ;;  %s1423_s18 = sshll.u32 %s1208_s7, 6  ;;  %s2105_s24 = sld [smem:[#allocation16_spill]] }
  0x65   : > { %763 = vmatprep.subr.bf16.mxu1 %v1576_v29  ;;  %s1195_s4 = scalar_lea.sflag [#allocation4], %s1956_s20  ;;  %s1694_s28 = scalar_lea.vmem %s2017_s13, 1024 }
  0x66   : > { %p1695_p1 = scmp.ne.s32.totalorder %s2017_s13, %s1694_s28  ;;  %s1803_s30 = smov [#allocation7]  }
  0x67   : > { %711 = vmatpush1.bf16.msra.mxu0 %v1578_v30  ;;  %s1698_s8 = sshll.u32 %s1803_s30, 4  ;;  %s1699_s8 = int_to_ptr.vmem [resolvable:$false] %s1698_s8 }
  0x68   : > { %764 = vmatpush1.bf16.msra.mxu1 %v1579_v31  ;;  %712 = vmatprep.subr.bf16.mxu0 %v1580_v32  ;;  %p1696_p8 = pnand %p1695_p1, %p1919_p11  ;;  %s1700_s15 = scalar_lea.vmem %s1699_s8, 2048 }
  0x69   : > { %765 = vmatprep.subr.bf16.mxu1 %v1582_v33  ;;  %p1701_p2 = scmp.lt.s32.totalorder %s2017_s13, %s1699_s8  ;;  %p1702_p0 = scmp.lt.s32.totalorder %s1700_s15, %s1694_s28 }
  0x6a   : > { %s2024_s5 = scalar_lea.hbm %s2105_s24, %s1423_s18  ;;  %p1697_p13 = pneg %p1696_p8 }
  0x6b   : > { %713 = vmatpush2.bf16.msra.mxu0 %v1584_v34  ;;  %p1703_p3 = por %p1702_p0, %p1701_p2 }
  0x6c   : > { %766 = vmatpush2.bf16.msra.mxu1 %v1585_v35  ;;  %714 = vmatprep.subr.bf16.mxu0 %v1586_v36 }
  0x6d   : > { %767 = vmatprep.subr.bf16.mxu1 %v1588_v37  ;;  %p1704_p5 = pnand %p1703_p3, %p1697_p13 }
  0x6f   : > { %715 = vmatpush2.bf16.msra.mxu0 %v1590_v38 }
  0x70   : > { %768 = vmatpush2.bf16.msra.mxu1 %v1591_v39  ;;  %716 = vmatprep.subr.bf16.mxu0 %v1592_v40 }
  0x71   : > { %769 = vmatprep.subr.bf16.mxu1 %v1594_v41 }
  0x73   : > { %717 = vmatpush2.bf16.msra.mxu0 %v1596_v42  ;;  %v818_v42 = vld [vmem:[%s2081_s3] sm:$0xff] }
  0x74   : > { %770 = vmatpush2.bf16.msra.mxu1 %v1597_v43  ;;  %718 = vmatprep.subr.bf16.mxu0 %v1598_v44 }
  0x75   : > { %771 = vmatprep.subr.bf16.mxu1 %v1600_v45 }
  0x77   : > { %719 = vmatpush2.bf16.msra.mxu0 %v1602_v46 }
  0x78   : > { %772 = vmatpush2.bf16.msra.mxu1 %v1603_v47  ;;  %720 = vmatprep.subr.bf16.mxu0 %v1604_v48 }
  0x79   : > { %773 = vmatprep.subr.bf16.mxu1 %v1606_v50 }
  0x7b   : > { %721 = vmatpush2.bf16.msra.mxu0 %v1608_v52 }
  0x7c   : > { %774 = vmatpush2.bf16.msra.mxu1 %v1609_v53  ;;  %722 = vmatprep.subr.bf16.mxu0 %v1610_v54  ;;  %v819_v54 = vld [vmem:[%s2081_s3 + $0x8] sm:$0xff] }
  0x7d   : > { %775 = vmatprep.subr.bf16.mxu1 %v1612_v55 }
  0x7f   : > { %723 = vmatpush2.bf16.msra.mxu0 %v1614_v56 }
  0x80   : > { %776 = vmatpush2.bf16.msra.mxu1 %v1615_v57  ;;  %724 = vmatprep.subr.bf16.mxu0 %v1616_v58 }
  0x81   : > { %777 = vmatprep.subr.bf16.mxu1 %v1618_v59 }
  0x83   : > { %725 = vmatpush2.bf16.msra.mxu0 %v1620_v60 }
  0x84   : > { %778 = vmatpush2.bf16.msra.mxu1 %v1621_v61  ;;  %726 = vmatprep.subr.bf16.mxu0 %v1622_v62 }
  0x85   : > { %779 = vmatprep.subr.bf16.mxu1 %v1624_v63 }
  0x87   : > { %727 = vmatpush2.bf16.msra.mxu0 %v1626_v0 }
  0x88   : > { %780 = vmatpush2.bf16.msra.mxu1 %v1627_v1 }
  0x8a   : > { %729 = vmatmul.mubr.bf16.vlgmr.msra.gmra.mxu0 %v1628_v2 }
  0x8b   : > { %782 = vmatmul.mubr.bf16.vlgmr.msra.gmra.mxu1 %v1631_v3  ;;  %738 = vmatprep.mubr.bf16.mxu0 %v1634_v4 }
  0x8c   : > { %791 = vmatprep.mubr.bf16.mxu1 %v1637_v5 }
  0x92   : > { %739 = vmatmul.mubr.bf16.gmra.mxu0 %v1636_v6 }
  0x93   : > { %792 = vmatmul.mubr.bf16.gmra.mxu1 %v1639_v7  ;;  %891 = vmatprep.mubr.f32.mxu0 %v1802_v8 }
  0x94   : > { %982 = vmatprep.mubr.f32.mxu1 %v1802_v8 }
 0x14a   : > { %v730_v16 = vpop.f32.mrf.mxu0 }
 0x14b   : > { %v783_v17 = vpop.f32.mrf.mxu1  ;;  %v731_v18 = vadd.f32 %v730_v16, %v329_v14 }
 0x14c   : > { %v732_v19 = vpop.f32.mrf.mxu0 }
 0x14d   : > { %v785_v20 = vpop.f32.mrf.mxu1  ;;  %v784_v21 = vadd.f32 %v783_v17, %v731_v18  ;;  %v733_v22 = vadd.f32 %v732_v19, %v333_v15 }
 0x14e   : > { %v734_v23 = vpop.f32.mrf.mxu0 }
 0x14f   : > { %v787_v24 = vpop.f32.mrf.mxu1  ;;  %v786_v25 = vadd.f32 %v785_v20, %v733_v22  ;;  %v735_v26 = vadd.f32 %v734_v23, %v329_v14  ;;  %v802_v27 = vmul.f32 0.01, %v784_v21 }
 0x150   : > { %v736_v28 = vpop.f32.mrf.mxu0 }
 0x151   : > { %v789_v29 = vpop.f32.mrf.mxu1  ;;  %v803_v30 = vmul.f32 0.01, %v786_v25  ;;  %v788_v31 = vadd.f32 %v787_v24, %v735_v26  ;;  %v737_v32 = vadd.f32 %v736_v28, %v333_v15  ;;  %v810_v38 = vmax.f32 %v784_v21, %v802_v27 }
 0x152   : > { %v740_v33 = vpop.f32.mrf.mxu0 }
 0x153   : > { %v793_v34 = vpop.f32.mrf.mxu1  ;;  %v811_v35 = vmax.f32 %v786_v25, %v803_v30  ;;  %v790_v36 = vadd.f32 %v789_v29, %v737_v32  ;;  %v741_v37 = vadd.f32 %v740_v33, %v329_v14  ;;  %v804_v39 = vmul.f32 0.01, %v788_v31 }
 0x154   : > { %v742_v40 = vpop.f32.mrf.mxu0 }
 0x155   : > { %v795_v41 = vpop.f32.mrf.mxu1  ;;  %v805_v43 = vmul.f32 0.01, %v790_v36  ;;  %v743_v44 = vadd.f32 %v742_v40, %v333_v15  ;;  %v794_v45 = vadd.f32 %v793_v34, %v741_v37  ;;  %857 = vmatprep.subr.mxu0 %v811_v35  ;;  %v812_v51 = vmax.f32 %v788_v31, %v804_v39 }
 0x156   : > { %v744_v46 = vpop.f32.mrf.mxu0  ;;  %858 = vmatpush1.msra.mxu0 %v810_v38 }
 0x157   : > { %v797_v47 = vpop.f32.mrf.mxu1  ;;  %v813_v48 = vmax.f32 %v790_v36, %v805_v43  ;;  %v745_v49 = vadd.f32 %v744_v46, %v329_v14  ;;  %v796_v50 = vadd.f32 %v795_v41, %v743_v44  ;;  %1397 = vmatmul.mubr.msk.f32.vlgmr.msra.gmra.mxu0 %vm820_vm0, %v818_v42  ;;  %v806_v52 = vmul.f32 0.01, %v794_v45 }
 0x158   : > { %v746_v53 = vpop.f32.mrf.mxu0  ;;  %897 = vmatprep.mubr.f32.mxu0 %v1802_v8 }
 0x159   : > { %v807_v55 = vmul.f32 0.01, %v796_v50  ;;  %v747_v56 = vadd.f32 %v746_v53, %v333_v15  ;;  %v798_v57 = vadd.f32 %v797_v47, %v745_v49  ;;  %948 = vmatprep.subr.mxu1 %v813_v48  ;;  %v799_v58 = vpop.f32.mrf.mxu1  ;;  %v814_v61 = vmax.f32 %v794_v45, %v806_v52 }
 0x15a   : > { %949 = vmatpush1.msra.mxu1 %v812_v51 }
 0x15b   : > { %v815_v59 = vmax.f32 %v796_v50, %v807_v55  ;;  %v800_v60 = vadd.f32 %v799_v58, %v747_v56  ;;  %1401 = vmatmul.mubr.msk.f32.vlgmr.msra.gmra.mxu1 %vm820_vm0, %v818_v42  ;;  %1398 = vmatmul.mubr.msk.f32.gmra.mxu0 %vm820_vm0, %v819_v54  ;;  %v808_v62 = vmul.f32 0.01, %v798_v57 }
 0x15c   : > { %988 = vmatprep.mubr.f32.mxu1 %v1802_v8  ;;  %1074 = vmatprep.mubr.f32.mxu0 %v1802_v8 }
 0x15d   : > { %v809_v63 = vmul.f32 0.01, %v800_v60  ;;  %1040 = vmatprep.subr.mxu0 %v815_v59  ;;  %v816_v1 = vmax.f32 %v798_v57, %v808_v62 }
 0x15e   : > { %1041 = vmatpush1.msra.mxu0 %v814_v61 }
 0x15f   : > { %v817_v0 = vmax.f32 %v800_v60, %v809_v63  ;;  %1402 = vmatmul.mubr.msk.f32.gmra.mxu1 %vm820_vm0, %v819_v54  ;;  %1407 = vmatmul.mubr.msk.f32.vlgmr.msra.gmra.mxu0 %vm820_vm0, %v818_v42 }
 0x160   : > { %1166 = vmatprep.mubr.f32.mxu1 %v1802_v8  ;;  %1080 = vmatprep.mubr.f32.mxu0 %v1802_v8 }
 0x161   : > { %1132 = vmatprep.subr.mxu1 %v817_v0 }
 0x162   : > { %1133 = vmatpush1.msra.mxu1 %v816_v1 }
 0x163   : > { %1413 = vmatmul.mubr.msk.f32.vlgmr.msra.gmra.mxu1 %vm820_vm0, %v818_v42  ;;  %1408 = vmatmul.mubr.msk.f32.gmra.mxu0 %vm820_vm0, %v819_v54 }
 0x164   : > { %1172 = vmatprep.mubr.f32.mxu1 %v1802_v8 }
 0x167   : > { %1414 = vmatmul.mubr.msk.f32.gmra.mxu1 %vm820_vm0, %v819_v54 }
 0x217   : > { %v893_v2 = vpop.f32.mrf.mxu0 }
 0x219   : > { %v895_v3 = vpop.f32.mrf.mxu0 }
 0x21a   : > { %v1427_v4 = vpack.c.bf16 %v895_v3, %v893_v2 }
 0x21b   : > { %v984_v5 = vpop.f32.mrf.mxu1  ;;  %v899_v6 = vpop.f32.mrf.mxu0 }
 0x21c   : > { %916 = vst [vmem:[%s2007_s10] sm:$0xff] %v1427_v4 }
 0x21d   : > { %v986_v7 = vpop.f32.mrf.mxu1  ;;  %v901_v9 = vpop.f32.mrf.mxu0 }
 0x21e   : > { %v1429_v8 = vpack.c.bf16 %v986_v7, %v984_v5  ;;  %v1428_v10 = vpack.c.bf16 %v901_v9, %v899_v6 }
 0x21f   : > { %v990_v11 = vpop.f32.mrf.mxu1  ;;  %v1076_v12 = vpop.f32.mrf.mxu0 }
 0x220   : > { %1405 = vst [vmem:[%s2007_s10 + $0x10] sm:$0xff] %v1429_v8  ;;  %917 = vst [vmem:[%s2007_s10 + $0x8] sm:$0xff] %v1428_v10 }
 0x221   : > { %v992_v13 = vpop.f32.mrf.mxu1  ;;  %v1078_v14 = vpop.f32.mrf.mxu0 }
 0x222   : > { %v1430_v15 = vpack.c.bf16 %v992_v13, %v990_v11  ;;  %v1431_v16 = vpack.c.bf16 %v1078_v14, %v1076_v12 }
 0x223   : > { %v1168_v17 = vpop.f32.mrf.mxu1  ;;  %v1082_v18 = vpop.f32.mrf.mxu0 }
 0x224   : > { %1406 = vst [vmem:[%s2007_s10 + $0x18] sm:$0xff] %v1430_v15  ;;  %1411 = vst [vmem:[%s2007_s10 + $0x20] sm:$0xff] %v1431_v16 }
 0x225   : > { %v1170_v19 = vpop.f32.mrf.mxu1  ;;  %v1084_v20 = vpop.f32.mrf.mxu0 }
 0x226   : > { %v1433_v21 = vpack.c.bf16 %v1170_v19, %v1168_v17  ;;  %v1432_v22 = vpack.c.bf16 %v1084_v20, %v1082_v18 }
 0x227   : > { %v1174_v23 = vpop.f32.mrf.mxu1 }
 0x228   : > { %1417 = vst [vmem:[%s2007_s10 + $0x30] sm:$0xff] %v1433_v21  ;;  %1412 = vst [vmem:[%s2007_s10 + $0x28] sm:$0xff] %v1432_v22 }
 0x229   : > { %v1176_v24 = vpop.f32.mrf.mxu1 }
 0x22a   : > { %v1434_v25 = vpack.c.bf16 %v1176_v24, %v1174_v23 }
 0x22c   : > { %1418 = vst [vmem:[%s2007_s10 + $0x38] sm:$0xff] %v1434_v25 }
 0x22d   : > { %1707 = shalt.err (!%p1704_p5)
}
 0x22e   : > { %s1708_s25 = scalar_lea.hbm %s2024_s5, 1024  ;;  %s1712_s26 = scalar_lea.hbm %s2105_s24, 4096 }
 0x22f   : > { %p1709_p4 = scmp.ne.s32.totalorder %s2024_s5, %s1708_s25  ;;  %p1713_p9 = scmp.lt.s32.totalorder %s2024_s5, %s2105_s24 }
 0x230   : > { %p1714_p10 = scmp.lt.s32.totalorder %s1712_s26, %s1708_s25 }
 0x231   : > { %p1710_p6 = pnand %p1709_p4, %p1919_p11 }
 0x232   : > { %p1715_p12 = por %p1714_p10, %p1713_p9 }
 0x233   : > { %p1711_p7 = pneg %p1710_p6 }
 0x235   : > { %p1716_p1 = pnand %p1715_p12, %p1711_p7 }
 0x237   : > { %1719 = shalt.err (!%p1716_p1)
}
 0x238   : > { %s1804_s14 = smov 128   ;;  %s1805_s6 = smov 8  }
 0x239   : > { %1442 = dma.vmem_to_hbm [thread:$0]  (%p1919_p11), %s2017_s13, 1024, %s2024_s5, %s1195_s4, %s1804_s14, %s1804_s14, %s1805_s6  }
 0x23a PF: > { %s2106_s7 = sld [smem:[#allocation11_spill]]  ;;  %p1459_p8 = scmp.ge.s32.totalorder %s1794_s22, 2 }
 0x23b   : > { %s2107_s18 = sld [smem:[#allocation13_spill]] }
 0x240   : > { %s1226_s19 = sand.u32 1, %s2106_s7  }
 0x241   : > { %p2108_p13 = scmp.ne.s32.totalorder %s2107_s18, 0  ;;  %s1227_s11 = scalar_lea.sflag [#allocation4], %s1226_s19 }
 0x243   : > { %p1453_p2 = pnand %p1459_p8, %p2108_p13 }
 0x245   : > { %p1454_p0 = pneg %p1453_p2 }
 0x247   : > { %1761 = dma.done.wait (%p1454_p0), %s1227_s11, 1024  }
 0x248   : > { %1763 = vsyncadd (%p1454_p0), %s1227_s11, 4294966272  ;;  %s21_s22 = sadd.s32 1, %s1794_s22   ;;  %s2109_s18 = sld [smem:[#allocation12_spill]] }
 0x249   : > { %p18_p3 = scmp.ge.s32.totalorder %s21_s22, 6   ;;  %s2110_s20 = sld [smem:[#allocation14_spill]] }
 0x24a   : > { %s2111_s15 = smov %s1770_s16  ;;  %s2112_s16 = smov %s1774_s17 }
 0x24b   : > { %s2113_s17 = smov %s1936_s1  ;;  %s2114_s19 = smov %s1790_s21 }
 0x24c   : > { %s2115_s21 = smov %s2121_s12  ;;  %20 = sbr.rel (!%p18_p3) target bundleno = 11 (0xb), region = 88 }
 0x251   :  { %1232 = vsyncpa [#allocation3], 1 }
 0x252   :  { %1234 = vsyncpa [#allocation3 + $0x1], 1 }
 0x253   :  { %1235 = vsyncpa [#allocation6], 1 }
 0x254   :  { %1236 = vsyncpa [#allocation4], 1 }
 0x255   :  { %1238 = vsyncpa [#allocation4 + $0x1], 1 }

</bundles_post_ra>
